<compile_context>
chip_gen: v5e
topology: v5e:2x2
jax: 0.10.0
libtpu: 0.0.40
codegen_flags: <defaults>
</compile_context>

<pallas_src>
import jax
import jax.numpy as jnp
from jax.experimental import pallas as pl
from jax.experimental.pallas import tpu as pltpu


def _round_up(n, m):
    return ((n + m - 1) // m) * m


def _leaky_relu(x, slope=0.2):
    return jnp.where(x > 0, x, slope * x)


def generator_kernel(x_ref,
                     w1_ref, b1_ref,
                     w2_ref, b2_ref,
                     w3_ref, b3_ref,
                     w4_ref, b4_ref,
                     out_ref):
    """Fused 4-layer MLP: bf16 MXU operands, f32 accumulate / elementwise."""

    def linear(h, w_ref, b_ref):
        # Cast activation to the weight dtype (bf16) for the MXU; accumulate
        # and add bias in f32.  (First layer: x is already bf16 -> no-op cast.)
        return jnp.dot(h.astype(w_ref.dtype), w_ref[...],
                       preferred_element_type=jnp.float32) + b_ref[...]

    h = x_ref[...]
    h = _leaky_relu(linear(h, w1_ref, b1_ref))
    h = _leaky_relu(linear(h, w2_ref, b2_ref))
    h = _leaky_relu(linear(h, w3_ref, b3_ref))
    out_ref[...] = jnp.tanh(linear(h, w4_ref, b4_ref)).astype(out_ref.dtype)


def generator_forward(x, params, *, tile_m=2048,
                      param_dtype=jnp.bfloat16, out_dtype=jnp.bfloat16):
    """x: [B, input_dim]. params: w{i} [in,out] (PyTorch weight.T), b{i} [1,out].

    Equivalent to: tanh(fc4(lrelu(fc3(lrelu(fc2(lrelu(fc1(x)))))))).
    Returns [B, output_dim] in `out_dtype` (bf16 by default).
    """
    B, din = x.shape
    h1 = params["w1"].shape[1]
    h2 = params["w2"].shape[1]
    h3 = params["w3"].shape[1]
    dout = params["w4"].shape[1]

    # Pad only the *hidden* feature dims to 128 lanes (zero rows/cols are
    # exact).  Input / output widths stay true-size so x and out stream
    # unpadded from/to HBM.  Do not pad beyond 128 (memory-bound; K/N=128 is
    # enough MXU work per byte).
    h1p, h2p, h3p = (_round_up(d, 128) for d in (h1, h2, h3))

    def wpad(name, rows, cols, dtype):
        a = params[name]
        a = jnp.pad(a, ((0, rows - a.shape[0]), (0, cols - a.shape[1])))
        return a.astype(dtype)

    weights = [
        wpad("w1", din, h1p, param_dtype), wpad("b1", 1, h1p, jnp.float32),
        wpad("w2", h1p, h2p, param_dtype), wpad("b2", 1, h2p, jnp.float32),
        wpad("w3", h2p, h3p, param_dtype), wpad("b3", 1, h3p, jnp.float32),
        wpad("w4", h3p, dout, param_dtype), wpad("b4", 1, dout, jnp.float32),
    ]

    B16 = _round_up(B, 16)            # bf16 sublane packing on the batch axis
    gridless = B16 <= 256

    if gridless:
        # Small problem: one invocation, everything VMEM-resident, no grid /
        # no pipeline machinery.
        B_p, tile, grid_n = B16, B16, 1
    else:
        # >=2 (even) grid steps so both v7x TensorCores get work; tile as large
        # as possible (<= tile_m) to amortize per-step pipeline overhead.
        grid_n = max(2, pl.cdiv(B16, tile_m))
        grid_n += grid_n % 2
        tile = _round_up(pl.cdiv(B16, grid_n), 16)
        B_p = tile * grid_n

    # Single fused cast(+row-pad) pass over x; noise producers upstream would
    # normally emit bf16 directly and fuse this away entirely.
    x_p = x.astype(param_dtype)
    if B_p != B:
        x_p = jnp.pad(x_p, ((0, B_p - B), (0, 0)))

    # Advisory cost on *true* (unpadded) FLOPs and real bytes moved.
    flops = 2 * B * (din * h1 + h1 * h2 + h2 * h3 + h3 * dout)
    bytes_accessed = (int(x_p.size) * x_p.dtype.itemsize
                      + sum(int(w.size) * w.dtype.itemsize for w in weights)
                      + B_p * dout * jnp.dtype(out_dtype).itemsize)
    cost = pl.CostEstimate(flops=flops, transcendentals=B * dout,
                           bytes_accessed=bytes_accessed)

    out_shape = jax.ShapeDtypeStruct((B_p, dout), out_dtype)

    if gridless:
        vmem = pltpu.MemorySpace.VMEM
        out_p = pl.pallas_call(
            generator_kernel,
            out_shape=out_shape,
            in_specs=[pl.BlockSpec(memory_space=vmem)] * (1 + len(weights)),
            out_specs=pl.BlockSpec(memory_space=vmem),
            cost_estimate=cost,
        )(x_p, *weights)
    else:
        # Batch-tiled: x/out stream per tile at true width; weights/biases use
        # a constant index_map so they stay VMEM-resident across the grid.
        in_specs = [pl.BlockSpec((tile, din), lambda i: (i, 0))]
        in_specs += [pl.BlockSpec(w.shape, lambda i: (0, 0)) for w in weights]
        out_p = pl.pallas_call(
            generator_kernel,
            out_shape=out_shape,
            grid=(grid_n,),
            in_specs=in_specs,
            out_specs=pl.BlockSpec((tile, dout), lambda i: (i, 0)),
            compiler_params=pltpu.CompilerParams(
                dimension_semantics=("parallel",),
                vmem_limit_bytes=32 * 1024 * 1024),
            cost_estimate=cost,
        )(x_p, *weights)

    return out_p if B_p == B else out_p[:B]


def init_params(key, input_dim, h1, h2, h3, output_dim):
    """Deterministic synthetic init (uniform, scaled like PyTorch Linear)."""
    dims = [(input_dim, h1), (h1, h2), (h2, h3), (h3, output_dim)]
    params = {}
    for i, (din, dout) in enumerate(dims, start=1):
        key, kw, kb = jax.random.split(key, 3)
        bound = 1.0 / float(jnp.sqrt(jnp.float32(din)))
        params[f"w{i}"] = jax.random.uniform(
            kw, (din, dout), jnp.float32, minval=-bound, maxval=bound)
        params[f"b{i}"] = jax.random.uniform(
            kb, (1, dout), jnp.float32, minval=-bound, maxval=bound)
    return params


def reference_forward(x, params):
    h = x
    for i in range(1, 4):
        h = jnp.dot(h, params[f"w{i}"]) + params[f"b{i}"]
        h = jnp.where(h > 0, h, 0.2 * h)
    h = jnp.dot(h, params["w4"]) + params["b4"]
    return jnp.tanh(h)


if __name__ == "__main__":
    input_dim, hidden1, hidden2, hidden3, output_dim = 16, 32, 64, 32, 16

    key = jax.random.PRNGKey(0)
    key, kp = jax.random.split(key)
    params = init_params(kp, input_dim, hidden1, hidden2, hidden3, output_dim)

    # Small batch -> gridless, fully VMEM-resident invocation.
    key, kx = jax.random.split(key)
    x_small = jax.random.normal(kx, (8, input_dim), jnp.float32)
    out_small = jax.block_until_ready(generator_forward(x_small, params))
    ref_small = reference_forward(x_small, params)
    assert out_small.shape == ref_small.shape
    assert jnp.allclose(out_small.astype(jnp.float32), ref_small,
                        atol=2e-2, rtol=2e-2), "small-batch mismatch vs reference"

    # Larger batch -> batch-tiled path (tile clamped so the grid has 2 steps
    # and both v7x TensorCores are used).
    key, kx2 = jax.random.split(key)
    x_big = jax.random.normal(kx2, (512, input_dim), jnp.float32)
    out_big = jax.block_until_ready(generator_forward(x_big, params))
    ref_big = reference_forward(x_big, params)
    assert out_big.shape == ref_big.shape
    assert jnp.allclose(out_big.astype(jnp.float32), ref_big,
                        atol=2e-2, rtol=2e-2), "batch-tiled mismatch vs reference"

    print("KERNEL_OK")
</pallas_src>

<mosaic_0001>
module attributes {stable_mosaic.version = 11 : i64} {
  func.func @generator_kernel(%arg0: memref<16x16xbf16, #tpu.memory_space<vmem>>, %arg1: memref<16x128xbf16, #tpu.memory_space<vmem>>, %arg2: memref<1x128xf32, #tpu.memory_space<vmem>>, %arg3: memref<128x128xbf16, #tpu.memory_space<vmem>>, %arg4: memref<1x128xf32, #tpu.memory_space<vmem>>, %arg5: memref<128x128xbf16, #tpu.memory_space<vmem>>, %arg6: memref<1x128xf32, #tpu.memory_space<vmem>>, %arg7: memref<128x16xbf16, #tpu.memory_space<vmem>>, %arg8: memref<1x16xf32, #tpu.memory_space<vmem>>, %arg9: memref<16x16xbf16, #tpu.memory_space<vmem>>) attributes {dimension_semantics = [], scalar_prefetch = 0 : i64, scratch_operands = 0 : i64, tpu.core_type = #tpu.core_type<tc>} {
    %c0 = arith.constant 0 : index
    %c0_0 = arith.constant 0 : index
    %0 = vector.load %arg0[%c0, %c0_0] : memref<16x16xbf16, #tpu.memory_space<vmem>>, vector<16x16xbf16>
    %c0_1 = arith.constant 0 : index
    %c0_2 = arith.constant 0 : index
    %1 = vector.load %arg1[%c0_1, %c0_2] : memref<16x128xbf16, #tpu.memory_space<vmem>>, vector<16x128xbf16>
    %cst = arith.constant dense<0.000000e+00> : vector<16x128xf32>
    %2 = tpu.matmul %0, %1, %cst {dimension_numbers = #tpu.dot_dimension_numbers<[1], [0], [0], [1], [0, 0, 1, 1], [], []>} : vector<16x16xbf16>, vector<16x128xbf16>, vector<16x128xf32> -> vector<16x128xf32>
    %c0_3 = arith.constant 0 : index
    %c0_4 = arith.constant 0 : index
    %3 = vector.load %arg2[%c0_3, %c0_4] : memref<1x128xf32, #tpu.memory_space<vmem>>, vector<1x128xf32>
    %4 = vector.broadcast %3 : vector<1x128xf32> to vector<16x128xf32>
    %5 = arith.addf %2, %4 : vector<16x128xf32>
    %cst_5 = arith.constant 0.000000e+00 : f32
    %6 = vector.broadcast %cst_5 : f32 to vector<16x128xf32>
    %7 = arith.cmpf ogt, %5, %6 : vector<16x128xf32>
    %cst_6 = arith.constant 2.000000e-01 : f32
    %8 = vector.broadcast %cst_6 : f32 to vector<16x128xf32>
    %9 = arith.mulf %8, %5 : vector<16x128xf32>
    %10 = arith.select %7, %5, %9 : vector<16x128xi1>, vector<16x128xf32>
    %11 = arith.truncf %10 : vector<16x128xf32> to vector<16x128xbf16>
    %c0_7 = arith.constant 0 : index
    %c0_8 = arith.constant 0 : index
    %12 = vector.load %arg3[%c0_7, %c0_8] : memref<128x128xbf16, #tpu.memory_space<vmem>>, vector<128x128xbf16>
    %cst_9 = arith.constant dense<0.000000e+00> : vector<16x128xf32>
    %13 = tpu.matmul %11, %12, %cst_9 {dimension_numbers = #tpu.dot_dimension_numbers<[1], [0], [0], [1], [0, 0, 1, 1], [], []>} : vector<16x128xbf16>, vector<128x128xbf16>, vector<16x128xf32> -> vector<16x128xf32>
    %c0_10 = arith.constant 0 : index
    %c0_11 = arith.constant 0 : index
    %14 = vector.load %arg4[%c0_10, %c0_11] : memref<1x128xf32, #tpu.memory_space<vmem>>, vector<1x128xf32>
    %15 = vector.broadcast %14 : vector<1x128xf32> to vector<16x128xf32>
    %16 = arith.addf %13, %15 : vector<16x128xf32>
    %cst_12 = arith.constant 0.000000e+00 : f32
    %17 = vector.broadcast %cst_12 : f32 to vector<16x128xf32>
    %18 = arith.cmpf ogt, %16, %17 : vector<16x128xf32>
    %cst_13 = arith.constant 2.000000e-01 : f32
    %19 = vector.broadcast %cst_13 : f32 to vector<16x128xf32>
    %20 = arith.mulf %19, %16 : vector<16x128xf32>
    %21 = arith.select %18, %16, %20 : vector<16x128xi1>, vector<16x128xf32>
    %22 = arith.truncf %21 : vector<16x128xf32> to vector<16x128xbf16>
    %c0_14 = arith.constant 0 : index
    %c0_15 = arith.constant 0 : index
    %23 = vector.load %arg5[%c0_14, %c0_15] : memref<128x128xbf16, #tpu.memory_space<vmem>>, vector<128x128xbf16>
    %cst_16 = arith.constant dense<0.000000e+00> : vector<16x128xf32>
    %24 = tpu.matmul %22, %23, %cst_16 {dimension_numbers = #tpu.dot_dimension_numbers<[1], [0], [0], [1], [0, 0, 1, 1], [], []>} : vector<16x128xbf16>, vector<128x128xbf16>, vector<16x128xf32> -> vector<16x128xf32>
    %c0_17 = arith.constant 0 : index
    %c0_18 = arith.constant 0 : index
    %25 = vector.load %arg6[%c0_17, %c0_18] : memref<1x128xf32, #tpu.memory_space<vmem>>, vector<1x128xf32>
    %26 = vector.broadcast %25 : vector<1x128xf32> to vector<16x128xf32>
    %27 = arith.addf %24, %26 : vector<16x128xf32>
    %cst_19 = arith.constant 0.000000e+00 : f32
    %28 = vector.broadcast %cst_19 : f32 to vector<16x128xf32>
    %29 = arith.cmpf ogt, %27, %28 : vector<16x128xf32>
    %cst_20 = arith.constant 2.000000e-01 : f32
    %30 = vector.broadcast %cst_20 : f32 to vector<16x128xf32>
    %31 = arith.mulf %30, %27 : vector<16x128xf32>
    %32 = arith.select %29, %27, %31 : vector<16x128xi1>, vector<16x128xf32>
    %33 = arith.truncf %32 : vector<16x128xf32> to vector<16x128xbf16>
    %c0_21 = arith.constant 0 : index
    %c0_22 = arith.constant 0 : index
    %34 = vector.load %arg7[%c0_21, %c0_22] : memref<128x16xbf16, #tpu.memory_space<vmem>>, vector<128x16xbf16>
    %cst_23 = arith.constant dense<0.000000e+00> : vector<16x16xf32>
    %35 = tpu.matmul %33, %34, %cst_23 {dimension_numbers = #tpu.dot_dimension_numbers<[1], [0], [0], [1], [0, 0, 1, 1], [], []>} : vector<16x128xbf16>, vector<128x16xbf16>, vector<16x16xf32> -> vector<16x16xf32>
    %c0_24 = arith.constant 0 : index
    %c0_25 = arith.constant 0 : index
    %36 = vector.load %arg8[%c0_24, %c0_25] : memref<1x16xf32, #tpu.memory_space<vmem>>, vector<1x16xf32>
    %37 = vector.broadcast %36 : vector<1x16xf32> to vector<16x16xf32>
    %38 = arith.addf %35, %37 : vector<16x16xf32>
    %39 = math.tanh %38 : vector<16x16xf32>
    %40 = arith.truncf %39 : vector<16x16xf32> to vector<16x16xbf16>
    %c0_26 = arith.constant 0 : index
    %c0_27 = arith.constant 0 : index
    %41 = vector.load %arg9[%c0_26, %c0_27] : memref<16x16xbf16, #tpu.memory_space<vmem>>, vector<16x16xbf16>
    tpu.vector_store %arg9[%c0_26, %c0_27], %40 {strides = array<i32>} : memref<16x16xbf16, #tpu.memory_space<vmem>>, vector<16x16xbf16>,
    return
  }
}

</mosaic_0001>

<bundles_post_ra>
// kernel: tpu_custom_call.1
= control target key start
LH: loop header
LB: loop body
LE: loop exit
PB: predicated region body
PF: predicated region fallthrough
CT: control target
= control target key end

     0   :  { %14 = vsyncpa [#allocation3], 0  ;;  %s755_s0 = inlined_call_operand.vmem [shape: bf16[16,16], index: 0, kind: input, shape index: {}]   ;;  %s756_s1 = inlined_call_operand.hbm [shape: bf16[16,128], index: 1, kind: input, shape index: {}]   ;;  %s757_s2 = inlined_call_operand.vmem [shape: f32[1,128], index: 2, kind: input, shape index: {}]   ;;  %s758_s3 = inlined_call_operand.vmem [shape: bf16[128,128], index: 3, kind: input, shape index: {}]   ;;  %s759_s4 = inlined_call_operand.vmem [shape: f32[1,128], index: 4, kind: input, shape index: {}]   ;;  %s760_s5 = inlined_call_operand.hbm [shape: bf16[128,128], index: 5, kind: input, shape index: {}]   ;;  %s761_s6 = inlined_call_operand.vmem [shape: f32[1,128], index: 6, kind: input, shape index: {}]   ;;  %s762_s7 = inlined_call_operand.vmem [shape: bf16[128,16], index: 7, kind: input, shape index: {}]   ;;  %s763_s8 = inlined_call_operand.vmem [shape: f32[1,16], index: 8, kind: input, shape index: {}]   ;;  %s764_s9 = inlined_call_operand.hbm [shape: bf16[16,16], index: 9, kind: output, shape index: {}]  }
   0x1   :  { %15 = vsyncpa [#allocation6], 0 }
   0x2   :  { %16 = vsyncpa [#allocation4], 0  ;;  %s23_s11 = sshll.u32 %s756_s1, 4  ;;  %s619_s12 = smov [#allocation2]   ;;  %s24_s11 = int_to_ptr.hbm [resolvable:$true] %s23_s11 }
   0x3   :  { %s25_s13 = sshll.u32 %s619_s12, 4  ;;  %s42_s16 = sshll.u32 %s760_s5, 4  ;;  %s26_s13 = int_to_ptr.vmem [resolvable:$true] %s25_s13  ;;  %s43_s16 = int_to_ptr.hbm [resolvable:$true] %s42_s16 }
   0x4   :  { %s620_s17 = smov 64   ;;  %s621_s18 = smov 4  }
   0x5   :  { %31 = dma.hbm_to_vmem [thread:$0]  %s24_s11, 128, %s26_s13, [#allocation3], %s620_s17, %s620_s17, %s621_s18  }
   0x6   :  { %s622_s19 = smov [#allocation5]  }
   0x7   :  { %s44_s20 = sshll.u32 %s622_s19, 4  ;;  %s45_s20 = int_to_ptr.vmem [resolvable:$true] %s44_s20 }
   0x8   :  { %50 = dma.hbm_to_vmem [thread:$0]  %s43_s16, 1024, %s45_s20, [#allocation6], %s620_s17, %s620_s17, %s621_s18  }
   0x9   :  { %613 = dma.done.wait [#allocation3], 128  }
   0xa   :  { %614 = vsyncadd [#allocation3], 4294967168 }
   0xb   :  { %615 = dma.done.wait [#allocation6], 1024  }
   0xc   :  { %616 = vsyncadd [#allocation6], 4294966272  ;;  %v503_v0 = vld [vmem:[#allocation2] sm:$0xff]  ;;  %v511_v1 = vld [vmem:[%s758_s3 + $0x38] sm:$0xff]  ;;  %vm85_vm0 = vcmask 130048   ;;  %vm374_vm7 = vcmask 125952  }
   0xd   :  { %v502_v2 = vld [vmem:[%s755_s0] sm:$0xff]  ;;  %96 = vmatpush.bf16.msra.mxu0 %v503_v0  ;;  %178 = vmatpush.bf16.msra.mxu1 %v511_v1  ;;  %v510_v3 = vld [vmem:[%s758_s3 + $0x30] sm:$0xff]  ;;  %v509_v4 = vld [vmem:[%s758_s3 + $0x28] sm:$0xff]  ;;  %s383_s16 = sshll.u32 %s764_s9, 4  ;;  %s384_s16 = int_to_ptr.hbm [resolvable:$true] %s383_s16 }
   0xe   :  { %v508_v5 = vld [vmem:[%s758_s3 + $0x20] sm:$0xff]  ;;  %v507_v6 = vld [vmem:[%s758_s3 + $0x18] sm:$0xff]  ;;  %v506_v7 = vld [vmem:[%s758_s3 + $0x10] sm:$0xff] }
   0xf   :  { %v505_v8 = vld [vmem:[%s758_s3 + $0x8] sm:$0xff]  ;;  %v504_v9 = vld [vmem:[%s758_s3] sm:$0xff]  ;;  %v518_v11 = vld [vmem:[#allocation5 + $0x30] sm:$0xff] }
  0x10   :  { %405 = vmatmul.msk.bf16.vlgmr.msra.gmra.mxu0 %vm85_vm0, %v502_v2  ;;  %v519_v10 = vld [vmem:[#allocation5 + $0x38] sm:$0xff]  ;;  %v517_v12 = vld [vmem:[#allocation5 + $0x28] sm:$0xff]  ;;  %v516_v13 = vld [vmem:[#allocation5 + $0x20] sm:$0xff] }
  0x11   :  { %179 = vmatpush.bf16.msra.mxu1 %v510_v3  ;;  %267 = vmatpush.bf16.msra.mxu2 %v519_v10  ;;  %v533_v15 = vld [vmem:[%s757_s2] ss:$0 sm:$0xff]  ;;  %v514_v25 = vld [vmem:[#allocation5 + $0x10] sm:$0xff]  ;;  %v513_v26 = vld [vmem:[#allocation5 + $0x8] sm:$0xff] }
  0x12   :  { %v515_v24 = vld [vmem:[#allocation5 + $0x18] sm:$0xff]  ;;  %v512_v27 = vld [vmem:[#allocation5] sm:$0xff]  ;;  %v527_v28 = vld [vmem:[%s762_s7 + $0x38] sm:$0xff] }
  0x13   :  { %356 = vmatpush.bf16.msra.mxu3 %v527_v28  ;;  %v526_v29 = vld [vmem:[%s762_s7 + $0x30] sm:$0xff]  ;;  %v525_v30 = vld [vmem:[%s762_s7 + $0x28] sm:$0xff]  ;;  %v524_v31 = vld [vmem:[%s762_s7 + $0x20] sm:$0xff] }
  0x14   :  { %v534_v33 = vld [vmem:[%s759_s4] ss:$0 sm:$0xff]  ;;  %v523_v42 = vld [vmem:[%s762_s7 + $0x18] sm:$0xff]  ;;  %v522_v43 = vld [vmem:[%s762_s7 + $0x10] sm:$0xff] }
  0x15   :  { %180 = vmatpush.bf16.msra.mxu1 %v509_v4  ;;  %268 = vmatpush.bf16.msra.mxu2 %v518_v11  ;;  %v521_v44 = vld [vmem:[%s762_s7 + $0x8] sm:$0xff]  ;;  %v520_v45 = vld [vmem:[%s762_s7] sm:$0xff] }
  0x16   :  { %v535_v47 = vld [vmem:[%s761_s6] ss:$0 sm:$0xff]  ;;  %s623_s6 = smov [#allocation7]  }
  0x17   :  { %357 = vmatpush.bf16.msra.mxu3 %v526_v29  ;;  %v536_v56 = vld [vmem:[%s763_s8] ss:$0 sm:$0xff]  ;;  %s381_s7 = sshll.u32 %s623_s6, 4  ;;  %s382_s7 = int_to_ptr.vmem [resolvable:$true] %s381_s7 }
  0x19   :  { %181 = vmatpush.bf16.msra.mxu1 %v508_v5  ;;  %269 = vmatpush.bf16.msra.mxu2 %v517_v12 }
  0x1b   :  { %358 = vmatpush.bf16.msra.mxu3 %v525_v30 }
  0x1d   :  { %182 = vmatpush.bf16.msra.mxu1 %v507_v6  ;;  %270 = vmatpush.bf16.msra.mxu2 %v516_v13 }
  0x1f   :  { %359 = vmatpush.bf16.msra.mxu3 %v524_v31 }
  0x21   :  { %183 = vmatpush.bf16.msra.mxu1 %v506_v7  ;;  %271 = vmatpush.bf16.msra.mxu2 %v515_v24 }
  0x23   :  { %360 = vmatpush.bf16.msra.mxu3 %v523_v42 }
  0x25   :  { %184 = vmatpush.bf16.msra.mxu1 %v505_v8  ;;  %272 = vmatpush.bf16.msra.mxu2 %v514_v25 }
  0x27   :  { %361 = vmatpush.bf16.msra.mxu3 %v522_v43 }
  0x29   :  { %185 = vmatpush.bf16.msra.mxu1 %v504_v9  ;;  %273 = vmatpush.bf16.msra.mxu2 %v513_v26 }
  0x2b   :  { %362 = vmatpush.bf16.msra.mxu3 %v521_v44 }
  0x2d   :  { %274 = vmatpush.bf16.msra.mxu2 %v512_v27 }
  0x2f   :  { %363 = vmatpush.bf16.msra.mxu3 %v520_v45 }
  0x8d   :  { %v98_v14 = vpop.f32.mrf.mxu0 }
  0x8e   :  { %v99_v16 = vadd.f32 %v533_v15, %v98_v14 }
  0x90   :  { %v105_v18 = vmul.f32 0.2, %v99_v16  ;;  %vm103_vm1 = vcmp.gt.f32.partialorder %v99_v16, 0.0 }
  0x92   :  { %v107_v21 = vsel %vm103_vm1, %v99_v16, %v105_v18 }
  0x95   :  { %v100_v17 = vpop.f32.mrf.mxu0 }
  0x96   :  { %v101_v19 = vadd.f32 %v533_v15, %v100_v17 }
  0x98   :  { %v106_v20 = vmul.f32 0.2, %v101_v19  ;;  %vm104_vm2 = vcmp.gt.f32.partialorder %v101_v19, 0.0 }
  0x9a   :  { %v108_v22 = vsel %vm104_vm2, %v101_v19, %v106_v20 }
  0x9b   :  { %v109_v23 = vpack.c.bf16 %v108_v22, %v107_v21 }
  0x9d   :  { %186 = vmatmul.bf16.vlgmr.msra.gmra.mxu1 %v109_v23 }
 0x11a   :  { %v187_v32 = vpop.f32.mrf.mxu1 }
 0x11b   :  { %v188_v34 = vadd.f32 %v534_v33, %v187_v32 }
 0x11d   :  { %v194_v36 = vmul.f32 0.2, %v188_v34  ;;  %vm192_vm3 = vcmp.gt.f32.partialorder %v188_v34, 0.0 }
 0x11f   :  { %v196_v39 = vsel %vm192_vm3, %v188_v34, %v194_v36 }
 0x122   :  { %v189_v35 = vpop.f32.mrf.mxu1 }
 0x123   :  { %v190_v37 = vadd.f32 %v534_v33, %v189_v35 }
 0x125   :  { %v195_v38 = vmul.f32 0.2, %v190_v37  ;;  %vm193_vm4 = vcmp.gt.f32.partialorder %v190_v37, 0.0 }
 0x127   :  { %v197_v40 = vsel %vm193_vm4, %v190_v37, %v195_v38 }
 0x128   :  { %v198_v41 = vpack.c.bf16 %v197_v40, %v196_v39 }
 0x12a   :  { %275 = vmatmul.bf16.vlgmr.msra.gmra.mxu2 %v198_v41 }
 0x1ad   :  { %v276_v46 = vpop.f32.mrf.mxu2 }
 0x1ae   :  { %v277_v48 = vadd.f32 %v535_v47, %v276_v46 }
 0x1b0   :  { %v283_v50 = vmul.f32 0.2, %v277_v48  ;;  %vm281_vm5 = vcmp.gt.f32.partialorder %v277_v48, 0.0 }
 0x1b2   :  { %v285_v53 = vsel %vm281_vm5, %v277_v48, %v283_v50 }
 0x1b5   :  { %v278_v49 = vpop.f32.mrf.mxu2 }
 0x1b6   :  { %v279_v51 = vadd.f32 %v535_v47, %v278_v49 }
 0x1b8   :  { %v284_v52 = vmul.f32 0.2, %v279_v51  ;;  %vm282_vm6 = vcmp.gt.f32.partialorder %v279_v51, 0.0 }
 0x1ba   :  { %v286_v54 = vsel %vm282_vm6, %v279_v51, %v284_v52 }
 0x1bb   :  { %v287_v55 = vpack.c.bf16 %v286_v54, %v285_v53 }
 0x1bd   :  { %364 = vmatmul.bf16.vlgmr.msra.gmra.mxu3 %v287_v55 }
 0x240   :  { %v365_v57 = vpop.f32.mrf.mxu3 }
 0x241   :  { %v366_v58 = vadd.f32 %v536_v56, %v365_v57 }
 0x243   :  { %537 = vtanh.f32 %v366_v58 }
 0x248   :  { %v367_v59 = vpop.f32.mrf.mxu3 }
 0x249   :  { %v538_v60 = vpop.eup %537  ;;  %v368_v61 = vadd.f32 %v536_v56, %v367_v59 }
 0x24a   :  { %v372_v62 = vpack.c.bf16 %v538_v60, %v538_v60 }
 0x24b   :  { %539 = vtanh.f32 %v368_v61 }
 0x24c   :  { %375 = vst.msk [vmem:[#allocation7] sm:$0xf] %vm374_vm7, %v372_v62 }
 0x251   :  { %v540_v63 = vpop.eup %539 }
 0x252   :  { %v373_v0 = vpack.c.bf16 %v540_v63, %v540_v63 }
 0x254   :  { %376 = vst.msk [vmem:[#allocation7 + $0x4] sm:$0xf] %vm374_vm7, %v373_v0 }
 0x255   :  { %389 = dma.vmem_to_hbm [thread:$0]  %s382_s7, 128, %s384_s16, [#allocation4], %s620_s17, %s620_s17, %s621_s18  }
 0x256   :  { %617 = dma.done.wait [#allocation4], 128  }
 0x257   :  { %618 = vsyncadd [#allocation4], 4294967168 }
 0x258   :  { %394 = vsyncpa [#allocation3], 1 }
 0x259   :  { %395 = vsyncpa [#allocation6], 1 }
 0x25a   :  { %396 = vsyncpa [#allocation4], 1 }

</bundles_post_ra>
